<compile_context>
chip_gen: v7x
topology: tpu7x:2x2x1
jax: 0.10.0
libtpu: 0.0.40
codegen_flags: <defaults>
</compile_context>

<pallas_src>
import functools

import jax
import jax.numpy as jnp
from jax.experimental import pallas as pl
from jax.experimental.pallas import tpu as pltpu

_LANE = 128      # last-dim tiling requirement
_SUBLANE = 8     # second-to-last-dim tiling requirement


def _round_up(x, m):
    return (x + m - 1) // m * m


def _mlp_kernel(x_ref, w1_ref, b1_ref, w2_ref, b2_ref, w3_ref, b3_ref, o_ref):
    """One batch tile: 3 bf16 MXU matmuls (f32 accumulation) + bias + ReLU."""
    x = x_ref[...].astype(jnp.bfloat16)

    h = jnp.dot(x, w1_ref[...], preferred_element_type=jnp.float32) + b1_ref[...]
    h = jnp.maximum(h, 0.0).astype(jnp.bfloat16)          # ReLU, bf16 MXU operand

    h = jnp.dot(h, w2_ref[...], preferred_element_type=jnp.float32) + b2_ref[...]
    h = jnp.maximum(h, 0.0).astype(jnp.bfloat16)          # ReLU, bf16 MXU operand

    out = jnp.dot(h, w3_ref[...], preferred_element_type=jnp.float32) + b3_ref[...]
    o_ref[...] = out.astype(o_ref.dtype)


def _vmem_estimate_bytes(tb, d_in, h1p, h2p, d_outp):
    """Rough VMEM usage for one batch tile (bf16 weights, f32 x/out/accum)."""
    weights = 2 * ((d_in * h1p + h1p * h2p + h2p * d_outp) * 2   # double-buffered bf16
                   + (h1p + h2p + d_outp) * 4)                   # f32 biases
    io_tiles = 2 * tb * (d_in + d_outp) * 4                      # double-buffered x / out
    temps = tb * (h1p + h2p + d_outp) * 4 + tb * (d_in + h1p + h2p) * 2
    return weights + io_tiles + temps


def _vmem_capacity_bytes():
    """Per-core VMEM capacity (128 MiB v5e/v6e, 64 MiB v7x); conservative fallback."""
    try:
        cap = int(pltpu.get_tpu_info().vmem_capacity_bytes)
        if cap > 0:
            return cap
    except Exception:
        pass
    return 64 * 1024 * 1024


def prepare_params(params, compute_dtype=jnp.bfloat16):
    """One-time padding of hidden/output dims to lane multiples + bf16 weight cast.

    Call ONCE at init and reuse the result; this keeps all per-call HBM padding
    traffic out of the forward path.  Dims already multiples of 128 are untouched.
    """
    w1, b1 = params["w1"], params["b1"]
    w2, b2 = params["w2"], params["b2"]
    w3, b3 = params["w3"], params["b3"]

    d_in, h1 = w1.shape
    h2 = w2.shape[1]
    d_out = w3.shape[1]
    h1p, h2p, d_outp = (_round_up(d, _LANE) for d in (h1, h2, d_out))

    def pad_to(a, shape):
        if a.shape == shape:
            return a
        return jnp.pad(a, [(0, t - s) for s, t in zip(a.shape, shape)])

    return {
        # Rows (K dims) stay unpadded; cols (N dims) are lane-padded with exact zeros.
        "w1": pad_to(w1, (d_in, h1p)).astype(compute_dtype),
        "b1": pad_to(b1, (1, h1p)).astype(jnp.float32),
        "w2": pad_to(w2, (h1p, h2p)).astype(compute_dtype),
        "b2": pad_to(b2, (1, h2p)).astype(jnp.float32),
        "w3": pad_to(w3, (h2p, d_outp)).astype(compute_dtype),
        "b3": pad_to(b3, (1, d_outp)).astype(jnp.float32),
    }


@functools.partial(jax.jit, static_argnames=("out_features", "tb_max", "trim_output"))
def mlp_forward(x, padded_params, *, out_features, tb_max=2048, trim_output=True):
    """Fused MLP forward. x: [B, input_size] (any B; feature dim need not be 128-aligned).

    padded_params: output of prepare_params() (lane-padded, bf16 weights).
    """
    w1, b1 = padded_params["w1"], padded_params["b1"]
    w2, b2 = padded_params["w2"], padded_params["b2"]
    w3, b3 = padded_params["w3"], padded_params["b3"]

    B, d_in = x.shape
    h1p, h2p, d_outp = w1.shape[1], w2.shape[1], w3.shape[1]

    # ---- generation-aware VMEM budget & batch-tile selection -----------------
    cap = _vmem_capacity_bytes()                     # 128 MiB (v5e/v6e), 64 MiB (v7x)
    vmem_limit = max(32 * 1024 * 1024, min(int(0.75 * cap), 112 * 1024 * 1024))
    budget = int(0.85 * vmem_limit)

    tb = min(tb_max, _round_up(B, _SUBLANE))
    if B >= 2 * _SUBLANE:
        # Keep >= 2 grid steps so the "parallel" batch axis can be split across
        # v7x's two TensorCores (one extra grid step is negligible on 1-TC chips).
        tb = min(tb, _round_up(pl.cdiv(B, 2), _SUBLANE))
    while tb > _SUBLANE and _vmem_estimate_bytes(tb, d_in, h1p, h2p, d_outp) > budget:
        tb = max(_SUBLANE, _round_up(tb // 2, _SUBLANE))

    grid = (pl.cdiv(B, tb),)                         # ragged final block handled by Pallas

    # x/out are tiled over the batch grid (auto double-buffered); weights & biases
    # use a constant index_map so they are DMA'd once and stay VMEM-resident.
    # TODO(synk): pipeline_mode=pl.Buffered(1) on the resident specs would halve
    # their (already tiny, <1 MiB) double-buffered footprint.
    in_specs = [
        pl.BlockSpec((tb, d_in), lambda i: (i, 0)),        # x tile (last dim = full array dim)
        pl.BlockSpec((d_in, h1p), lambda i: (0, 0)),       # w1 (resident)
        pl.BlockSpec((1, h1p), lambda i: (0, 0)),          # b1
        pl.BlockSpec((h1p, h2p), lambda i: (0, 0)),        # w2
        pl.BlockSpec((1, h2p), lambda i: (0, 0)),          # b2
        pl.BlockSpec((h2p, d_outp), lambda i: (0, 0)),     # w3
        pl.BlockSpec((1, d_outp), lambda i: (0, 0)),       # b3
    ]
    out_specs = pl.BlockSpec((tb, d_outp), lambda i: (i, 0))

    out = pl.pallas_call(
        _mlp_kernel,
        out_shape=jax.ShapeDtypeStruct((B, d_outp), x.dtype),
        grid=grid,
        in_specs=in_specs,
        out_specs=out_specs,
        compiler_params=pltpu.CompilerParams(
            dimension_semantics=("parallel",),   # shard batch tiles across TCs (v7x)
            vmem_limit_bytes=int(vmem_limit),
        ),
    )(x, w1, b1, w2, b2, w3, b3)

    if trim_output:
        # Batch is never padded; only strip the lane padding on the feature dim.
        out = out[:, :out_features]
    return out


def init_mlp_params(key, input_size, common_size, dtype=jnp.float32):
    """PyTorch-Linear-like uniform init. Weights stored [in_features, out_features]."""
    h1 = input_size // 2
    h2 = input_size // 4
    keys = jax.random.split(key, 6)

    def lin(kw, kb, fan_in, fan_out):
        bound = 1.0 / jnp.sqrt(fan_in)
        w = jax.random.uniform(kw, (fan_in, fan_out), dtype, -bound, bound)
        b = jax.random.uniform(kb, (1, fan_out), dtype, -bound, bound)
        return w, b

    w1, b1 = lin(keys[0], keys[1], input_size, h1)
    w2, b2 = lin(keys[2], keys[3], h1, h2)
    w3, b3 = lin(keys[4], keys[5], h2, common_size)
    return {"w1": w1, "b1": b1, "w2": w2, "b2": b2, "w3": w3, "b3": b3}


def mlp_reference(x, params, match_kernel_precision=True):
    """Pure-JAX reference; optionally mirrors the kernel's bf16-operand / f32-accum numerics."""
    cast = (lambda a: a.astype(jnp.bfloat16)) if match_kernel_precision else (lambda a: a)
    h = jnp.dot(cast(x), cast(params["w1"]),
                preferred_element_type=jnp.float32) + params["b1"]
    h = jnp.maximum(h, 0.0)
    h = jnp.dot(cast(h), cast(params["w2"]),
                preferred_element_type=jnp.float32) + params["b2"]
    h = jnp.maximum(h, 0.0)
    return jnp.dot(cast(h), cast(params["w3"]),
                   preferred_element_type=jnp.float32) + params["b3"]


if __name__ == "__main__":
    key = jax.random.PRNGKey(0)
    kx, kp, kx2, kp2 = jax.random.split(key, 4)

    # --- small shape consistent with the module spec --------------------------
    batch, input_size, common_size = 2, 32, 8
    x = jax.random.normal(kx, (batch, input_size), dtype=jnp.float32)
    params = init_mlp_params(kp, input_size, common_size)
    pparams = prepare_params(params)          # one-time pad + bf16 cast (not per call)

    out = jax.block_until_ready(mlp_forward(x, pparams, out_features=common_size))
    ref = mlp_reference(x, params)
    assert out.shape == (batch, common_size), out.shape
    assert jnp.allclose(out, ref, atol=2e-2, rtol=2e-2), "mismatch vs reference (small)"

    # --- larger shape: multi-step ragged batch grid, unpadded-x fast path -----
    batch2, input_size2, common_size2 = 300, 256, 10
    x2 = jax.random.normal(kx2, (batch2, input_size2), dtype=jnp.float32)
    params2 = init_mlp_params(kp2, input_size2, common_size2)
    pparams2 = prepare_params(params2)

    out2 = jax.block_until_ready(mlp_forward(x2, pparams2, out_features=common_size2))
    ref2 = mlp_reference(x2, params2)
    assert out2.shape == (batch2, common_size2), out2.shape
    assert jnp.allclose(out2, ref2, atol=2e-2, rtol=2e-2), "mismatch vs reference (large)"

    print("KERNEL_OK")
</pallas_src>

<mosaic_0001>
module attributes {stable_mosaic.version = 11 : i64} {
  func.func @_mlp_kernel(%arg0: i32, %arg1: memref<8x32xf32, #tpu.memory_space<vmem>>, %arg2: memref<32x128xbf16, #tpu.memory_space<vmem>>, %arg3: memref<1x128xf32, #tpu.memory_space<vmem>>, %arg4: memref<128x128xbf16, #tpu.memory_space<vmem>>, %arg5: memref<1x128xf32, #tpu.memory_space<vmem>>, %arg6: memref<128x128xbf16, #tpu.memory_space<vmem>>, %arg7: memref<1x128xf32, #tpu.memory_space<vmem>>, %arg8: memref<8x128xf32, #tpu.memory_space<vmem>>) attributes {dimension_semantics = [#tpu.dimension_semantics<parallel>], iteration_bounds = array<i64: 1>, scalar_prefetch = 0 : i64, scratch_operands = 0 : i64, tpu.core_type = #tpu.core_type<tc>, window_params = [{transform_indices = @transform_0, window_bounds = array<i64: 8, 32>}, {pipeline_mode = #tpu.pipeline_mode<synchronous>, transform_indices = @transform_1, window_bounds = array<i64: 32, 128>}, {pipeline_mode = #tpu.pipeline_mode<synchronous>, transform_indices = @transform_2, window_bounds = array<i64: 1, 128>}, {pipeline_mode = #tpu.pipeline_mode<synchronous>, transform_indices = @transform_3, window_bounds = array<i64: 128, 128>}, {pipeline_mode = #tpu.pipeline_mode<synchronous>, transform_indices = @transform_4, window_bounds = array<i64: 1, 128>}, {pipeline_mode = #tpu.pipeline_mode<synchronous>, transform_indices = @transform_5, window_bounds = array<i64: 128, 128>}, {pipeline_mode = #tpu.pipeline_mode<synchronous>, transform_indices = @transform_6, window_bounds = array<i64: 1, 128>}, {transform_indices = @transform_7, window_bounds = array<i64: 8, 128>}]} {
    %c0 = arith.constant 0 : index
    %c0_0 = arith.constant 0 : index
    %0 = vector.load %arg1[%c0, %c0_0] : memref<8x32xf32, #tpu.memory_space<vmem>>, vector<8x32xf32>
    %1 = arith.truncf %0 : vector<8x32xf32> to vector<8x32xbf16>
    %c0_1 = arith.constant 0 : index
    %c0_2 = arith.constant 0 : index
    %2 = vector.load %arg2[%c0_1, %c0_2] : memref<32x128xbf16, #tpu.memory_space<vmem>>, vector<32x128xbf16>
    %cst = arith.constant dense<0.000000e+00> : vector<8x128xf32>
    %3 = tpu.matmul %1, %2, %cst {dimension_numbers = #tpu.dot_dimension_numbers<[1], [0], [0], [1], [0, 0, 1, 1], [], []>} : vector<8x32xbf16>, vector<32x128xbf16>, vector<8x128xf32> -> vector<8x128xf32>
    %c0_3 = arith.constant 0 : index
    %c0_4 = arith.constant 0 : index
    %4 = vector.load %arg3[%c0_3, %c0_4] : memref<1x128xf32, #tpu.memory_space<vmem>>, vector<1x128xf32>
    %5 = vector.broadcast %4 : vector<1x128xf32> to vector<8x128xf32>
    %6 = arith.addf %3, %5 : vector<8x128xf32>
    %cst_5 = arith.constant 0.000000e+00 : f32
    %7 = vector.broadcast %cst_5 : f32 to vector<8x128xf32>
    %8 = arith.maximumf %6, %7 : vector<8x128xf32>
    %9 = arith.truncf %8 : vector<8x128xf32> to vector<8x128xbf16>
    %c0_6 = arith.constant 0 : index
    %c0_7 = arith.constant 0 : index
    %10 = vector.load %arg4[%c0_6, %c0_7] : memref<128x128xbf16, #tpu.memory_space<vmem>>, vector<128x128xbf16>
    %cst_8 = arith.constant dense<0.000000e+00> : vector<8x128xf32>
    %11 = tpu.matmul %9, %10, %cst_8 {dimension_numbers = #tpu.dot_dimension_numbers<[1], [0], [0], [1], [0, 0, 1, 1], [], []>} : vector<8x128xbf16>, vector<128x128xbf16>, vector<8x128xf32> -> vector<8x128xf32>
    %c0_9 = arith.constant 0 : index
    %c0_10 = arith.constant 0 : index
    %12 = vector.load %arg5[%c0_9, %c0_10] : memref<1x128xf32, #tpu.memory_space<vmem>>, vector<1x128xf32>
    %13 = vector.broadcast %12 : vector<1x128xf32> to vector<8x128xf32>
    %14 = arith.addf %11, %13 : vector<8x128xf32>
    %cst_11 = arith.constant 0.000000e+00 : f32
    %15 = vector.broadcast %cst_11 : f32 to vector<8x128xf32>
    %16 = arith.maximumf %14, %15 : vector<8x128xf32>
    %17 = arith.truncf %16 : vector<8x128xf32> to vector<8x128xbf16>
    %c0_12 = arith.constant 0 : index
    %c0_13 = arith.constant 0 : index
    %18 = vector.load %arg6[%c0_12, %c0_13] : memref<128x128xbf16, #tpu.memory_space<vmem>>, vector<128x128xbf16>
    %cst_14 = arith.constant dense<0.000000e+00> : vector<8x128xf32>
    %19 = tpu.matmul %17, %18, %cst_14 {dimension_numbers = #tpu.dot_dimension_numbers<[1], [0], [0], [1], [0, 0, 1, 1], [], []>} : vector<8x128xbf16>, vector<128x128xbf16>, vector<8x128xf32> -> vector<8x128xf32>
    %c0_15 = arith.constant 0 : index
    %c0_16 = arith.constant 0 : index
    %20 = vector.load %arg7[%c0_15, %c0_16] : memref<1x128xf32, #tpu.memory_space<vmem>>, vector<1x128xf32>
    %21 = vector.broadcast %20 : vector<1x128xf32> to vector<8x128xf32>
    %22 = arith.addf %19, %21 : vector<8x128xf32>
    %c0_17 = arith.constant 0 : index
    %c0_18 = arith.constant 0 : index
    %23 = vector.load %arg8[%c0_17, %c0_18] : memref<8x128xf32, #tpu.memory_space<vmem>>, vector<8x128xf32>
    tpu.vector_store %arg8[%c0_17, %c0_18], %22 {strides = array<i32>} : memref<8x128xf32, #tpu.memory_space<vmem>>, vector<8x128xf32>,
    return
  }
  func.func @transform_0(%arg0: i32) -> (i32, i32) {
    %c0_i32 = arith.constant 0 : i32
    %c0_i32_0 = arith.constant 0 : i32
    return %arg0, %c0_i32 : i32, i32
  }
  func.func @transform_1(%arg0: i32) -> (i32, i32) {
    %c0_i32 = arith.constant 0 : i32
    %c0_i32_0 = arith.constant 0 : i32
    %c0_i32_1 = arith.constant 0 : i32
    return %c0_i32, %c0_i32_0 : i32, i32
  }
  func.func @transform_2(%arg0: i32) -> (i32, i32) {
    %c0_i32 = arith.constant 0 : i32
    %c0_i32_0 = arith.constant 0 : i32
    %c0_i32_1 = arith.constant 0 : i32
    return %c0_i32, %c0_i32_0 : i32, i32
  }
  func.func @transform_3(%arg0: i32) -> (i32, i32) {
    %c0_i32 = arith.constant 0 : i32
    %c0_i32_0 = arith.constant 0 : i32
    %c0_i32_1 = arith.constant 0 : i32
    return %c0_i32, %c0_i32_0 : i32, i32
  }
  func.func @transform_4(%arg0: i32) -> (i32, i32) {
    %c0_i32 = arith.constant 0 : i32
    %c0_i32_0 = arith.constant 0 : i32
    %c0_i32_1 = arith.constant 0 : i32
    return %c0_i32, %c0_i32_0 : i32, i32
  }
  func.func @transform_5(%arg0: i32) -> (i32, i32) {
    %c0_i32 = arith.constant 0 : i32
    %c0_i32_0 = arith.constant 0 : i32
    %c0_i32_1 = arith.constant 0 : i32
    return %c0_i32, %c0_i32_0 : i32, i32
  }
  func.func @transform_6(%arg0: i32) -> (i32, i32) {
    %c0_i32 = arith.constant 0 : i32
    %c0_i32_0 = arith.constant 0 : i32
    %c0_i32_1 = arith.constant 0 : i32
    return %c0_i32, %c0_i32_0 : i32, i32
  }
  func.func @transform_7(%arg0: i32) -> (i32, i32) {
    %c0_i32 = arith.constant 0 : i32
    %c0_i32_0 = arith.constant 0 : i32
    return %arg0, %c0_i32 : i32, i32
  }
}

</mosaic_0001>

<bundles_post_ra>
// kernel: mlp_forward.1
= control target key start
LH: loop header
LB: loop body
LE: loop exit
PB: predicated region body
PF: predicated region fallthrough
CT: control target
= control target key end

     0   :  { %12 = vsyncpa [#allocation3], 0  ;;  %s802_s0 = inlined_call_operand.hbm [shape: f32[2,32], index: 0, kind: input, shape index: {}]   ;;  %s803_s1 = inlined_call_operand.hbm [shape: bf16[32,128], index: 1, kind: input, shape index: {}]   ;;  %s804_s2 = inlined_call_operand.vmem [shape: f32[1,128], index: 2, kind: input, shape index: {}]   ;;  %s805_s3 = inlined_call_operand.hbm [shape: bf16[128,128], index: 3, kind: input, shape index: {}]   ;;  %s806_s4 = inlined_call_operand.vmem [shape: f32[1,128], index: 4, kind: input, shape index: {}]   ;;  %s807_s5 = inlined_call_operand.hbm [shape: bf16[128,128], index: 5, kind: input, shape index: {}]   ;;  %s808_s6 = inlined_call_operand.vmem [shape: f32[1,128], index: 6, kind: input, shape index: {}]   ;;  %s809_s7 = inlined_call_operand.hbm [shape: f32[2,128], index: 7, kind: output, shape index: {}]  }
   0x1   :  { %13 = vsyncpa [#allocation6], 0 }
   0x2   :  { %14 = vsyncpa [#allocation9], 0 }
   0x3   :  { %15 = vsyncpa [#allocation4], 0 }
   0x4   :  { %20 = vsyncadd [#allocation3], 96  ;;  %s636_s24 = smov [#allocation5]   ;;  %s518_s28 = scalar_lea.hbm %s803_s1, 256 }
   0x5   :  { %s33_s25 = sshll.u32 %s636_s24, 4  ;;  %p519_p0 = scmp.ne.s32.totalorder %s803_s1, %s518_s28  ;;  %s34_s25 = int_to_ptr.vmem [resolvable:$true] %s33_s25 }
   0x6   :  { %p522_p1 = scmp.lt.u32.totalorder %s518_s28, %s803_s1 }
   0x8   :  { %p524_p2 = pnand %p522_p1, %p519_p0 }
   0xa   :  { %527 = shalt.err (!%p524_p2)
}
   0xb   :  { %s528_s10 = scalar_lea.vmem %s34_s25, 256  ;;  %p533_p4 = scmp.lt.s32.totalorder %s34_s25, %s34_s25 }
   0xc   :  { %p529_p3 = scmp.ne.s32.totalorder %s34_s25, %s528_s10  ;;  %p534_p5 = scmp.lt.s32.totalorder %s528_s10, %s528_s10 }
   0xe   :  { %p535_p6 = por %p534_p5, %p533_p4 }
  0x10   :  { %p536_p7 = pnand %p535_p6, %p529_p3 }
  0x12   :  { %539 = shalt.err (!%p536_p7)
}
  0x13   :  { %s637_s11 = smov 64   ;;  %s638_s12 = smov 4  }
  0x14   :  { %39 = dma.hbm_to_vmem [thread:$0]  %s803_s1, 256, %s34_s25, [#allocation6], %s637_s11, %s637_s11, %s638_s12  }
  0x15   :  { %s639_s15 = smov [#allocation2]   ;;  %s540_s19 = scalar_lea.hbm %s802_s0, 32 }
  0x16   :  { %s21_s16 = sshll.u32 %s639_s15, 4  ;;  %p541_p8 = scmp.ne.s32.totalorder %s802_s0, %s540_s19  ;;  %s22_s16 = int_to_ptr.vmem [resolvable:$true] %s21_s16 }
  0x17   :  { %p544_p9 = scmp.lt.u32.totalorder %s540_s19, %s802_s0 }
  0x19   :  { %p546_p10 = pnand %p544_p9, %p541_p8 }
  0x1b   :  { %549 = shalt.err (!%p546_p10)
}
  0x1c   :  { %s550_s24 = scalar_lea.vmem %s22_s16, 32  ;;  %s554_s1 = scalar_lea.vmem %s22_s16, 128 }
  0x1d   :  { %p551_p11 = scmp.ne.s32.totalorder %s22_s16, %s550_s24  ;;  %p555_p12 = scmp.lt.s32.totalorder %s22_s16, %s22_s16 }
  0x1e   :  { %p556_p13 = scmp.lt.s32.totalorder %s554_s1, %s550_s24 }
  0x20   :  { %p557_p0 = por %p556_p13, %p555_p12 }
  0x22   :  { %p558_p1 = pnand %p557_p0, %p551_p11 }
  0x24   :  { %561 = shalt.err (!%p558_p1)
}
  0x25   :  { %s640_s25 = smov 32   ;;  %s641_s26 = smov 2  }
  0x26   :  { %27 = dma.hbm_to_vmem [thread:$0]  %s802_s0, 32, %s22_s16, [#allocation3], %s640_s25, %s640_s25, %s641_s26  }
  0x27   :  { %s642_s29 = smov [#allocation7]   ;;  %s643_s8 = smov [#allocation8]  }
  0x28   :  { %s47_s30 = sshll.u32 %s642_s29, 4  ;;  %s61_s9 = sshll.u32 %s643_s8, 4  ;;  %s48_s30 = int_to_ptr.vmem [resolvable:$true] %s47_s30  ;;  %s717_s9 = int_to_ptr.vmem [resolvable:$true] %s61_s9 }
  0x29   :  { %s562_s14 = scalar_lea.hbm %s805_s3, 1024 }
  0x2a   :  { %p563_p2 = scmp.ne.s32.totalorder %s805_s3, %s562_s14  ;;  %p566_p3 = scmp.lt.u32.totalorder %s562_s14, %s805_s3 }
  0x2c   :  { %p568_p4 = pnand %p566_p3, %p563_p2 }
  0x2e   :  { %571 = shalt.err (!%p568_p4)
}
  0x2f   :  { %s572_s0 = scalar_lea.vmem %s48_s30, 1024  ;;  %p577_p6 = scmp.lt.s32.totalorder %s48_s30, %s48_s30 }
  0x30   :  { %p573_p5 = scmp.ne.s32.totalorder %s48_s30, %s572_s0  ;;  %p578_p7 = scmp.lt.s32.totalorder %s572_s0, %s572_s0 }
  0x32   :  { %p579_p8 = por %p578_p7, %p577_p6 }
  0x34   :  { %p580_p9 = pnand %p579_p8, %p573_p5 }
  0x36   :  { %583 = shalt.err (!%p580_p9)
}
  0x37   :  { %53 = dma.hbm_to_vmem [thread:$0]  %s805_s3, 1024, %s48_s30, [#allocation6], %s637_s11, %s637_s11, %s638_s12  }
  0x38   :  { %s584_s23 = scalar_lea.hbm %s807_s5, 1024 }
  0x39   :  { %p585_p10 = scmp.ne.s32.totalorder %s807_s5, %s584_s23  ;;  %p588_p11 = scmp.lt.u32.totalorder %s584_s23, %s807_s5 }
  0x3b   :  { %p590_p12 = pnand %p588_p11, %p585_p10 }
  0x3d   :  { %593 = shalt.err (!%p590_p12)
}
  0x3e   :  { %s594_s29 = scalar_lea.vmem %s717_s9, 1024  ;;  %p599_p0 = scmp.lt.s32.totalorder %s717_s9, %s717_s9 }
  0x3f   :  { %p595_p13 = scmp.ne.s32.totalorder %s717_s9, %s594_s29  ;;  %p600_p1 = scmp.lt.s32.totalorder %s594_s29, %s594_s29 }
  0x41   :  { %p601_p2 = por %p600_p1, %p599_p0 }
  0x43   :  { %p602_p3 = pnand %p601_p2, %p595_p13 }
  0x45   :  { %605 = shalt.err (!%p602_p3)
}
  0x46   :  { %67 = dma.hbm_to_vmem [thread:$0]  %s807_s5, 1024, %s717_s9, [#allocation9], %s637_s11, %s637_s11, %s638_s12  }
  0x47   :  { %628 = dma.done.wait [#allocation3], 128  }
  0x48   :  { %629 = vsyncadd [#allocation3], 4294967168 }
  0x49   :  { %630 = dma.done.wait [#allocation6], 1280  }
  0x4a   :  { %631 = vsyncadd [#allocation6], 4294966016 }
  0x4b   :  { %632 = dma.done.wait [#allocation9], 1024  }
  0x4c   :  { %633 = vsyncadd [#allocation9], 4294966272  ;;  %v644_v0 = vmov 0.0   ;;  %vm645_vm0 = vmmov 0   ;;  %v500_v1 = vld [vmem:[#allocation5] sm:$0xff]   ;;  %v501_v2 = vld [vmem:[#allocation5 + $0x8] sm:$0xff]  }
  0x4d   :  { %441 = vmatprep.subr.bf16.mxu0 %v644_v0  ;;  %445 = vmatprep.mubr.msk.bf16.mxu0 %vm645_vm0, %v644_v0  ;;  %v83_v3 = vld [vmem:[#allocation2] sm:$0xff]  ;;  %v502_v4 = vld [vmem:[#allocation7] sm:$0xff]   ;;  %vm108_vm1 = vcmask 261120   ;;  %v504_v7 = vld [vmem:[#allocation7 + $0x10] sm:$0xff]  }
  0x4e   :  { %449 = vmatprep.subr.bf16.mxu1 %v644_v0  ;;  %465 = vmatprep.mubr.msk.bf16.mxu1 %vm645_vm0, %v644_v0  ;;  %v84_v5 = vpack.c.bf16 %v83_v3, %v83_v3  ;;  %v503_v6 = vld [vmem:[#allocation7 + $0x8] sm:$0xff]   ;;  %v505_v8 = vld [vmem:[#allocation7 + $0x18] sm:$0xff]   ;;  %v506_v9 = vld [vmem:[#allocation7 + $0x20] sm:$0xff]  }
  0x4f   :  { %442 = vmatpush3.bf16.msra.mxu0 %v500_v1  ;;  %450 = vmatpush3.bf16.msra.mxu1 %v502_v4  ;;  %v507_v10 = vld [vmem:[#allocation7 + $0x28] sm:$0xff]   ;;  %v508_v11 = vld [vmem:[#allocation7 + $0x30] sm:$0xff]   ;;  %v509_v12 = vld [vmem:[#allocation7 + $0x38] sm:$0xff]  }
  0x50   :  { %443 = vmatprep.subr.bf16.mxu0 %v644_v0  ;;  %451 = vmatprep.subr.bf16.mxu1 %v644_v0  ;;  %v510_v13 = vld [vmem:[#allocation8] sm:$0xff]   ;;  %v511_v14 = vld [vmem:[#allocation8 + $0x8] sm:$0xff]   ;;  %v512_v15 = vld [vmem:[#allocation8 + $0x10] sm:$0xff]  }
  0x51   :  { %v513_v16 = vld [vmem:[#allocation8 + $0x18] sm:$0xff]   ;;  %v514_v17 = vld [vmem:[#allocation8 + $0x20] sm:$0xff]   ;;  %v515_v18 = vld [vmem:[#allocation8 + $0x28] sm:$0xff]  }
  0x52   :  { %v398_v19 = vld [vmem:[%s804_s2] ss:$0 sm:$0xff]  ;;  %v516_v27 = vld [vmem:[#allocation8 + $0x30] sm:$0xff]   ;;  %v517_v28 = vld [vmem:[#allocation8 + $0x38] sm:$0xff]  }
  0x53   :  { %444 = vmatpush3.bf16.msra.mxu0 %v501_v2  ;;  %452 = vmatpush3.bf16.msra.mxu1 %v503_v6  ;;  %v402_v29 = vld [vmem:[%s806_s4] ss:$0 sm:$0xff] }
  0x54   :  { %469 = vmatprep.subr.bf16.mxu0 %v644_v0  ;;  %453 = vmatprep.subr.bf16.mxu1 %v644_v0  ;;  %v411_v37 = vld [vmem:[%s808_s6] ss:$0 sm:$0xff] }
  0x56   :  { %446 = vmatmul.mubr.msk.bf16.vlgmr.msra.gmra.mrb[0].mxu0 %vm108_vm1, %v84_v5 }
  0x57   :  { %485 = vmatprep.mubr.msk.bf16.mxu0 %vm645_vm0, %v644_v0  ;;  %454 = vmatpush3.bf16.msra.mxu1 %v504_v7 }
  0x58   :  { %455 = vmatprep.subr.bf16.mxu1 %v644_v0  ;;  %470 = vmatpush3.bf16.msra.mxu0 %v510_v13 }
  0x59   :  { %471 = vmatprep.subr.bf16.mxu0 %v644_v0 }
  0x5b   :  { %456 = vmatpush3.bf16.msra.mxu1 %v505_v8 }
  0x5c   :  { %457 = vmatprep.subr.bf16.mxu1 %v644_v0  ;;  %472 = vmatpush3.bf16.msra.mxu0 %v511_v14 }
  0x5d   :  { %473 = vmatprep.subr.bf16.mxu0 %v644_v0 }
  0x5f   :  { %458 = vmatpush3.bf16.msra.mxu1 %v506_v9 }
  0x60   :  { %459 = vmatprep.subr.bf16.mxu1 %v644_v0  ;;  %474 = vmatpush3.bf16.msra.mxu0 %v512_v15 }
  0x61   :  { %475 = vmatprep.subr.bf16.mxu0 %v644_v0 }
  0x63   :  { %460 = vmatpush3.bf16.msra.mxu1 %v507_v10 }
  0x64   :  { %461 = vmatprep.subr.bf16.mxu1 %v644_v0  ;;  %476 = vmatpush3.bf16.msra.mxu0 %v513_v16 }
  0x65   :  { %477 = vmatprep.subr.bf16.mxu0 %v644_v0 }
  0x67   :  { %462 = vmatpush3.bf16.msra.mxu1 %v508_v11 }
  0x68   :  { %463 = vmatprep.subr.bf16.mxu1 %v644_v0  ;;  %478 = vmatpush3.bf16.msra.mxu0 %v514_v17 }
  0x69   :  { %479 = vmatprep.subr.bf16.mxu0 %v644_v0 }
  0x6b   :  { %464 = vmatpush3.bf16.msra.mxu1 %v509_v12 }
  0x6c   :  { %480 = vmatpush3.bf16.msra.mxu0 %v515_v18 }
  0x6d   :  { %481 = vmatprep.subr.bf16.mxu0 %v644_v0 }
  0x70   :  { %482 = vmatpush3.bf16.msra.mxu0 %v516_v27 }
  0x71   :  { %483 = vmatprep.subr.bf16.mxu0 %v644_v0 }
  0x74   :  { %484 = vmatpush3.bf16.msra.mxu0 %v517_v28 }
 0x129   :  { %v146_v20 = vpop.f32.mrb[0].mxu0 }
 0x12a   :  { %v147_v21 = vadd.f32 %v398_v19, %v146_v20  ;;  %v447_v22 = vpop.f32.mrb[1].mxu0 }
 0x12b   :  { %v149_v23 = vpop.f32.mrb[2].mxu0 }
 0x12c   :  { %v152_v24 = vmax.f32 %v147_v21, 0.0  ;;  %v448_v25 = vpop.f32.mrb[3].mxu0 }
 0x12e   :  { %v153_v26 = vpack.c.bf16 %v152_v24, %v152_v24 }
 0x130   :  { %466 = vmatmul.mubr.bf16.vlgmr.msra.gmra.mrb[0].mxu1 %v153_v26 }
 0x203   :  { %v259_v30 = vpop.f32.mrb[0].mxu1 }
 0x204   :  { %v260_v31 = vadd.f32 %v402_v29, %v259_v30  ;;  %v467_v32 = vpop.f32.mrb[1].mxu1 }
 0x205   :  { %v262_v33 = vpop.f32.mrb[2].mxu1 }
 0x206   :  { %v265_v34 = vmax.f32 %v260_v31, 0.0  ;;  %v468_v35 = vpop.f32.mrb[3].mxu1 }
 0x208   :  { %v266_v36 = vpack.c.bf16 %v265_v34, %v265_v34 }
 0x20a   :  { %486 = vmatmul.mubr.bf16.vlgmr.msra.gmra.mrb[4].mxu0 %v266_v36 }
 0x2dd   :  { %v372_v38 = vpop.f32.mrb[4].mxu0 }
 0x2de   :  { %v373_v39 = vadd.f32 %v411_v37, %v372_v38  ;;  %v487_v40 = vpop.f32.mrb[5].mxu0 }
 0x2df   :  { %v375_v41 = vpop.f32.mrb[6].mxu0 }
 0x2e0   :  { %378 = vst [vmem:[#allocation10] sm:$0xff] %v373_v39  ;;  %v488_v42 = vpop.f32.mrb[7].mxu0 }
 0x2e1   :  { %383 = vsyncadd [#allocation4], 96  ;;  %s646_s4 = smov [#allocation10]  }
 0x2e2   :  { %s384_s10 = sshll.u32 %s646_s4, 4  ;;  %s385_s10 = int_to_ptr.vmem [resolvable:$true] %s384_s10 }
 0x2e3   :  { %s606_s13 = scalar_lea.vmem %s385_s10, 32  ;;  %s610_s14 = scalar_lea.vmem %s385_s10, 128 }
 0x2e4   :  { %p607_p4 = scmp.ne.s32.totalorder %s385_s10, %s606_s13  ;;  %p611_p5 = scmp.lt.s32.totalorder %s385_s10, %s385_s10 }
 0x2e5   :  { %p612_p6 = scmp.lt.s32.totalorder %s610_s14, %s606_s13 }
 0x2e7   :  { %p613_p7 = por %p612_p6, %p611_p5 }
 0x2e9   :  { %p614_p8 = pnand %p613_p7, %p607_p4 }
 0x2eb   :  { %617 = shalt.err (!%p614_p8)
}
 0x2ec   :  { %s618_s17 = scalar_lea.hbm %s809_s7, 32 }
 0x2ed   :  { %p619_p9 = scmp.ne.s32.totalorder %s809_s7, %s618_s17  ;;  %p622_p10 = scmp.lt.u32.totalorder %s618_s17, %s809_s7 }
 0x2ef   :  { %p624_p11 = pnand %p622_p10, %p619_p9 }
 0x2f1   :  { %627 = shalt.err (!%p624_p11)
}
 0x2f2   :  { %390 = dma.vmem_to_hbm [thread:$0]  %s385_s10, 32, %s809_s7, [#allocation4], %s640_s25, %s640_s25, %s641_s26  }
 0x2f3   :  { %634 = dma.done.wait [#allocation4], 128  }
 0x2f4   :  { %635 = vsyncadd [#allocation4], 4294967168 }
 0x2f5   :  { %394 = vsyncpa [#allocation3], 1 }
 0x2f6   :  { %395 = vsyncpa [#allocation6], 1 }
 0x2f7   :  { %396 = vsyncpa [#allocation9], 1 }
 0x2f8   :  { %397 = vsyncpa [#allocation4], 1 }

</bundles_post_ra>
